<compile_context>
chip_gen: v7x
topology: tpu7x:2x2x1
jax: 0.10.0
libtpu: 0.0.40
codegen_flags: <defaults>
</compile_context>

<pallas_src>
import functools

import jax
import jax.numpy as jnp
from jax import lax
from jax.experimental import pallas as pl
from jax.experimental.pallas import tpu as pltpu

LANES = 128
DEFAULT_BLOCK_ROWS = 16384  # 16384 * 128 * 4B = 8 MiB per f32 input block


def _moments_kernel(nblk, chunks_full, chunks_last, rem_last,
                    x_ref, y_ref, o_ref):
    """Write per-lane partial raw moments of this block into o_ref (1,40,128).

    Row groups of the output block: [0:8]=sum x, [8:16]=sum y, [16:24]=sum x*x,
    [24:32]=sum y*y, [32:40]=sum x*y.  All trip counts are trace-time static.
    """

    def accum_and_store(nchunks, rem):
        zeros = jnp.zeros((8, LANES), jnp.float32)

        def body(j, carry):
            sx, sy, sxx, syy, sxy = carry
            r = pl.multiple_of(j * 8, 8)
            xs = x_ref[pl.ds(r, 8), :].astype(jnp.float32)
            ys = y_ref[pl.ds(r, 8), :].astype(jnp.float32)
            return (sx + xs, sy + ys,
                    sxx + xs * xs, syy + ys * ys, sxy + xs * ys)

        if nchunks > 0:
            init = (zeros, zeros, zeros, zeros, zeros)
            sx, sy, sxx, syy, sxy = lax.fori_loop(
                0, nchunks, body, init, unroll=min(8, nchunks))
        else:
            sx = sy = sxx = syy = sxy = zeros

        if rem:
            # One-time fold of the last (rem < 8) valid rows of this block.
            # Static in-bounds partial load; garbage never touched, no concat.
            base = nchunks * 8
            xs = x_ref[base:base + rem, :].astype(jnp.float32)
            ys = y_ref[base:base + rem, :].astype(jnp.float32)
            row0 = lax.broadcasted_iota(jnp.int32, (8, LANES), 0) == 0

            def fold(acc, part):
                psum = jnp.sum(part, axis=0, keepdims=True)          # (1,128)
                return acc + jnp.where(
                    row0, jnp.broadcast_to(psum, (8, LANES)), 0.0)

            sx = fold(sx, xs)
            sy = fold(sy, ys)
            sxx = fold(sxx, xs * xs)
            syy = fold(syy, ys * ys)
            sxy = fold(sxy, xs * ys)

        o_ref[0, 0:8, :] = sx
        o_ref[0, 8:16, :] = sy
        o_ref[0, 16:24, :] = sxx
        o_ref[0, 24:32, :] = syy
        o_ref[0, 32:40, :] = sxy

    if nblk == 1:
        accum_and_store(chunks_last, rem_last)
    elif chunks_last == chunks_full and rem_last == 0:
        accum_and_store(chunks_full, 0)          # rows divides evenly
    else:
        last = pl.program_id(0) == nblk - 1

        @pl.when(jnp.logical_not(last))
        def _not_last():
            accum_and_store(chunks_full, 0)      # hot path: no masking at all

        @pl.when(last)
        def _last():
            accum_and_store(chunks_last, rem_last)


def pearson_loss(output, target, *, block_rows=DEFAULT_BLOCK_ROWS):
    """Pearson correlation of two same-shaped arrays via a tiled Pallas reduction."""
    assert output.shape == target.shape, "output/target shapes must match"
    n = output.size
    x = output.reshape(-1)
    y = target.reshape(-1)
    rows = n // LANES
    kernel_elems = rows * LANES
    f32 = jnp.float32

    if rows > 0:
        if kernel_elems == n:
            x2 = x.reshape(rows, LANES)          # pure bitcast, no copy
            y2 = y.reshape(rows, LANES)
        else:
            # Contiguous-prefix view; only needed when n % 128 != 0 and never
            # a full padded copy (the <128 tail is handled below in the wrapper).
            x2 = x[:kernel_elems].reshape(rows, LANES)
            y2 = y[:kernel_elems].reshape(rows, LANES)

        # Sublane multiple required by the narrower dtype (f32:8, bf16:16, i8:32).
        itemsize = min(x2.dtype.itemsize, y2.dtype.itemsize)
        sub = {4: 8, 2: 16, 1: 32}.get(itemsize, 8)

        if rows <= block_rows:
            br, nblk = rows, 1                   # full-extent block (always legal)
        else:
            br = max(sub, (block_rows // sub) * sub)
            nblk = -(-rows // br)
        vrows_last = rows - (nblk - 1) * br      # valid rows in the last block
        chunks_full = br // 8
        chunks_last = vrows_last // 8
        rem_last = vrows_last % 8

        kernel = functools.partial(
            _moments_kernel, nblk, chunks_full, chunks_last, rem_last)

        # Double-buffered inputs + small output blocks + headroom.
        in_block_bytes = br * LANES * (x2.dtype.itemsize + y2.dtype.itemsize)
        vmem_limit = int(min(64 << 20, max(16 << 20,
                                           2 * in_block_bytes + (4 << 20))))

        partial = pl.pallas_call(
            kernel,
            out_shape=jax.ShapeDtypeStruct((nblk, 40, LANES), f32),
            grid=(nblk,),
            in_specs=[
                pl.BlockSpec((br, LANES), lambda i: (i, 0)),
                pl.BlockSpec((br, LANES), lambda i: (i, 0)),
            ],
            out_specs=pl.BlockSpec((1, 40, LANES), lambda i: (i, 0, 0)),
            compiler_params=pltpu.CompilerParams(
                # Independent per-block outputs -> fully parallel grid axis;
                # on v7x this lets Mosaic shard the stream across both cores.
                dimension_semantics=("parallel",),
                vmem_limit_bytes=vmem_limit,
            ),
        )(x2, y2)

        sums = jnp.sum(partial.reshape(nblk, 5, 8, LANES), axis=(0, 2, 3))
        sx, sy, sxx, syy, sxy = (sums[0], sums[1], sums[2], sums[3], sums[4])
    else:
        sx = sy = sxx = syy = sxy = f32(0.0)

    if kernel_elems < n:
        # <128-element tail (or tiny inputs with rows == 0): fold in wrapper.
        xt = x[kernel_elems:].astype(f32)
        yt = y[kernel_elems:].astype(f32)
        sx = sx + jnp.sum(xt)
        sy = sy + jnp.sum(yt)
        sxx = sxx + jnp.sum(xt * xt)
        syy = syy + jnp.sum(yt * yt)
        sxy = sxy + jnp.sum(xt * yt)

    inv_n = f32(1.0 / n)
    mx = sx * inv_n
    my = sy * inv_n
    num = sxy - mx * sy    # = sum((x - mx) * (y - my))
    vxx = sxx - mx * sx    # = sum((x - mx) ** 2)
    vyy = syy - my * sy    # = sum((y - my) ** 2)
    return num / (jnp.sqrt(vxx) * jnp.sqrt(vyy))


def _pearson_ref(output, target):
    x = output.reshape(-1).astype(jnp.float32)
    y = target.reshape(-1).astype(jnp.float32)
    vx = x - jnp.mean(x)
    vy = y - jnp.mean(y)
    return jnp.sum(vx * vy) / (jnp.sqrt(jnp.sum(vx ** 2)) * jnp.sqrt(jnp.sum(vy ** 2)))


if __name__ == "__main__":
    key = jax.random.PRNGKey(0)
    k1, k2, k3, k4 = jax.random.split(key, 4)

    def check(out, tgt, atol=1e-4, **kw):
        got = jax.block_until_ready(pearson_loss(out, tgt, **kw))
        want = jax.block_until_ready(_pearson_ref(out, tgt))
        assert jnp.allclose(got, want, atol=atol, rtol=atol), (got, want)

    # Small NCHW-style tensors, as the loss would receive from a conv net.
    output = jax.random.normal(k1, (2, 4, 16, 16), dtype=jnp.float32)
    target = 0.5 * output + 0.3 * jax.random.normal(k2, (2, 4, 16, 16), dtype=jnp.float32)
    check(output, target)

    # Multi-block grid with a ragged (sub-8-row) last block.
    out2 = jax.random.normal(k3, (2, 4, 16, 20), dtype=jnp.float32)
    tgt2 = -0.7 * out2 + 0.5 * jax.random.normal(k4, (2, 4, 16, 20), dtype=jnp.float32)
    check(out2, tgt2, block_rows=8)

    # Element count not a multiple of 128 (wrapper-side tail, no padded copy).
    out3 = jax.random.normal(k1, (2, 3, 5, 7), dtype=jnp.float32)
    tgt3 = 0.9 * out3 + 0.1 * jax.random.normal(k2, (2, 3, 5, 7), dtype=jnp.float32)
    check(out3, tgt3)

    # Tiny input (< 128 elements): wrapper-only path.
    out4 = jax.random.normal(k3, (3, 7), dtype=jnp.float32)
    tgt4 = out4 + 0.2 * jax.random.normal(k4, (3, 7), dtype=jnp.float32)
    check(out4, tgt4)

    # bf16 inputs stream in native dtype and are cast to f32 in-register.
    check(output.astype(jnp.bfloat16), target.astype(jnp.bfloat16), atol=1e-3)

    print("KERNEL_OK")
</pallas_src>

<mosaic_0001>
module attributes {stable_mosaic.version = 11 : i64} {
  func.func @_moments_kernel(%arg0: i32, %arg1: memref<16x128xf32, #tpu.memory_space<vmem>>, %arg2: memref<16x128xf32, #tpu.memory_space<vmem>>, %arg3: memref<1x40x128xf32, #tpu.memory_space<vmem>>) attributes {dimension_semantics = [#tpu.dimension_semantics<parallel>], iteration_bounds = array<i64: 1>, scalar_prefetch = 0 : i64, scratch_operands = 0 : i64, tpu.core_type = #tpu.core_type<tc>, window_params = [{transform_indices = @transform_0, window_bounds = array<i64: 16, 128>}, {transform_indices = @transform_1, window_bounds = array<i64: 16, 128>}, {transform_indices = @transform_2, window_bounds = array<i64: 1, 40, 128>}]} {
    %cst = arith.constant 0.000000e+00 : f32
    %0 = vector.broadcast %cst : f32 to vector<8x128xf32>
    %c0_i32 = arith.constant 0 : i32
    %c8_i32 = arith.constant 8 : i32
    %1 = arith.muli %c0_i32, %c8_i32 : i32
    %2 = tpu.assume_multiple %1, 8 : i32
    %3 = arith.index_cast %2 : i32 to index
    %c0 = arith.constant 0 : index
    %4 = vector.load %arg1[%3, %c0] : memref<16x128xf32, #tpu.memory_space<vmem>>, vector<8x128xf32>
    %5 = arith.index_cast %2 : i32 to index
    %c0_0 = arith.constant 0 : index
    %6 = vector.load %arg2[%5, %c0_0] : memref<16x128xf32, #tpu.memory_space<vmem>>, vector<8x128xf32>
    %7 = arith.addf %0, %4 : vector<8x128xf32>
    %8 = arith.addf %0, %6 : vector<8x128xf32>
    %9 = arith.mulf %4, %4 : vector<8x128xf32>
    %10 = arith.addf %0, %9 : vector<8x128xf32>
    %11 = arith.mulf %6, %6 : vector<8x128xf32>
    %12 = arith.addf %0, %11 : vector<8x128xf32>
    %13 = arith.mulf %4, %6 : vector<8x128xf32>
    %14 = arith.addf %0, %13 : vector<8x128xf32>
    %c1_i32 = arith.constant 1 : i32
    %c8_i32_1 = arith.constant 8 : i32
    %15 = arith.muli %c1_i32, %c8_i32_1 : i32
    %16 = tpu.assume_multiple %15, 8 : i32
    %17 = arith.index_cast %16 : i32 to index
    %c0_2 = arith.constant 0 : index
    %18 = vector.load %arg1[%17, %c0_2] : memref<16x128xf32, #tpu.memory_space<vmem>>, vector<8x128xf32>
    %19 = arith.index_cast %16 : i32 to index
    %c0_3 = arith.constant 0 : index
    %20 = vector.load %arg2[%19, %c0_3] : memref<16x128xf32, #tpu.memory_space<vmem>>, vector<8x128xf32>
    %21 = arith.addf %7, %18 : vector<8x128xf32>
    %22 = arith.addf %8, %20 : vector<8x128xf32>
    %23 = arith.mulf %18, %18 : vector<8x128xf32>
    %24 = arith.addf %10, %23 : vector<8x128xf32>
    %25 = arith.mulf %20, %20 : vector<8x128xf32>
    %26 = arith.addf %12, %25 : vector<8x128xf32>
    %27 = arith.mulf %18, %20 : vector<8x128xf32>
    %28 = arith.addf %14, %27 : vector<8x128xf32>
    %c2_i32 = arith.constant 2 : i32
    %c0_4 = arith.constant 0 : index
    %c0_5 = arith.constant 0 : index
    %c0_6 = arith.constant 0 : index
    %29 = vector.load %arg3[%c0_4, %c0_5, %c0_6] : memref<1x40x128xf32, #tpu.memory_space<vmem>>, vector<1x8x128xf32>
    %30 = vector.shape_cast %29 : vector<1x8x128xf32> to vector<8x128xf32>
    %31 = vector.shape_cast %21 : vector<8x128xf32> to vector<1x8x128xf32>
    tpu.vector_store %arg3[%c0_4, %c0_5, %c0_6], %31 {strides = array<i32>} : memref<1x40x128xf32, #tpu.memory_space<vmem>>, vector<1x8x128xf32>,
    %c0_7 = arith.constant 0 : index
    %c8 = arith.constant 8 : index
    %c0_8 = arith.constant 0 : index
    %32 = vector.load %arg3[%c0_7, %c8, %c0_8] : memref<1x40x128xf32, #tpu.memory_space<vmem>>, vector<1x8x128xf32>
    %33 = vector.shape_cast %32 : vector<1x8x128xf32> to vector<8x128xf32>
    %34 = vector.shape_cast %22 : vector<8x128xf32> to vector<1x8x128xf32>
    tpu.vector_store %arg3[%c0_7, %c8, %c0_8], %34 {strides = array<i32>} : memref<1x40x128xf32, #tpu.memory_space<vmem>>, vector<1x8x128xf32>,
    %c0_9 = arith.constant 0 : index
    %c16 = arith.constant 16 : index
    %c0_10 = arith.constant 0 : index
    %35 = vector.load %arg3[%c0_9, %c16, %c0_10] : memref<1x40x128xf32, #tpu.memory_space<vmem>>, vector<1x8x128xf32>
    %36 = vector.shape_cast %35 : vector<1x8x128xf32> to vector<8x128xf32>
    %37 = vector.shape_cast %24 : vector<8x128xf32> to vector<1x8x128xf32>
    tpu.vector_store %arg3[%c0_9, %c16, %c0_10], %37 {strides = array<i32>} : memref<1x40x128xf32, #tpu.memory_space<vmem>>, vector<1x8x128xf32>,
    %c0_11 = arith.constant 0 : index
    %c24 = arith.constant 24 : index
    %c0_12 = arith.constant 0 : index
    %38 = vector.load %arg3[%c0_11, %c24, %c0_12] : memref<1x40x128xf32, #tpu.memory_space<vmem>>, vector<1x8x128xf32>
    %39 = vector.shape_cast %38 : vector<1x8x128xf32> to vector<8x128xf32>
    %40 = vector.shape_cast %26 : vector<8x128xf32> to vector<1x8x128xf32>
    tpu.vector_store %arg3[%c0_11, %c24, %c0_12], %40 {strides = array<i32>} : memref<1x40x128xf32, #tpu.memory_space<vmem>>, vector<1x8x128xf32>,
    %c0_13 = arith.constant 0 : index
    %c32 = arith.constant 32 : index
    %c0_14 = arith.constant 0 : index
    %41 = vector.load %arg3[%c0_13, %c32, %c0_14] : memref<1x40x128xf32, #tpu.memory_space<vmem>>, vector<1x8x128xf32>
    %42 = vector.shape_cast %41 : vector<1x8x128xf32> to vector<8x128xf32>
    %43 = vector.shape_cast %28 : vector<8x128xf32> to vector<1x8x128xf32>
    tpu.vector_store %arg3[%c0_13, %c32, %c0_14], %43 {strides = array<i32>} : memref<1x40x128xf32, #tpu.memory_space<vmem>>, vector<1x8x128xf32>,
    return
  }
  func.func @transform_0(%arg0: i32) -> (i32, i32) {
    %c0_i32 = arith.constant 0 : i32
    %c0_i32_0 = arith.constant 0 : i32
    return %arg0, %c0_i32 : i32, i32
  }
  func.func @transform_1(%arg0: i32) -> (i32, i32) {
    %c0_i32 = arith.constant 0 : i32
    %c0_i32_0 = arith.constant 0 : i32
    return %arg0, %c0_i32 : i32, i32
  }
  func.func @transform_2(%arg0: i32) -> (i32, i32, i32) {
    %c0_i32 = arith.constant 0 : i32
    %c0_i32_0 = arith.constant 0 : i32
    %c0_i32_1 = arith.constant 0 : i32
    return %arg0, %c0_i32, %c0_i32_0 : i32, i32, i32
  }
}

</mosaic_0001>

<bundles_post_ra>
// kernel: tpu_custom_call.1
= control target key start
LH: loop header
LB: loop body
LE: loop exit
PB: predicated region body
PF: predicated region fallthrough
CT: control target
= control target key end

     0   :  { %7 = vsyncpa [#allocation3], 0  ;;  %s227_s0 = inlined_call_operand.hbm [shape: f32[16,128], index: 0, kind: input, shape index: {}]   ;;  %s228_s1 = inlined_call_operand.hbm [shape: f32[16,128], index: 1, kind: input, shape index: {}]   ;;  %s229_s2 = inlined_call_operand.hbm [shape: f32[1,40,128], index: 2, kind: output, shape index: {}]  }
   0x1   :  { %8 = vsyncpa [#allocation6], 0 }
   0x2   :  { %9 = vsyncpa [#allocation4], 0  ;;  %s162_s9 = smov [#allocation2]   ;;  %s90_s13 = scalar_lea.hbm %s227_s0, 256 }
   0x3   :  { %s15_s10 = sshll.u32 %s162_s9, 4  ;;  %p91_p0 = scmp.ne.s32.totalorder %s227_s0, %s90_s13  ;;  %s16_s10 = int_to_ptr.vmem [resolvable:$true] %s15_s10 }
   0x4   :  { %p94_p1 = scmp.lt.u32.totalorder %s90_s13, %s227_s0 }
   0x6   :  { %p96_p2 = pnand %p94_p1, %p91_p0 }
   0x8   :  { %99 = shalt.err (!%p96_p2)
}
   0x9   :  { %s100_s18 = scalar_lea.vmem %s16_s10, 256  ;;  %p105_p4 = scmp.lt.s32.totalorder %s16_s10, %s16_s10 }
   0xa   :  { %p101_p3 = scmp.ne.s32.totalorder %s16_s10, %s100_s18  ;;  %p106_p5 = scmp.lt.s32.totalorder %s100_s18, %s100_s18 }
   0xc   :  { %p107_p6 = por %p106_p5, %p105_p4 }
   0xe   :  { %p108_p7 = pnand %p107_p6, %p101_p3 }
  0x10   :  { %111 = shalt.err (!%p108_p7)
}
  0x11   :  { %s163_s19 = smov 128   ;;  %s164_s20 = smov 8  }
  0x12   :  { %21 = dma.hbm_to_vmem [thread:$0]  %s227_s0, 256, %s16_s10, [#allocation3], %s163_s19, %s163_s19, %s164_s20  }
  0x13   :  { %s165_s23 = smov [#allocation5]   ;;  %s112_s27 = scalar_lea.hbm %s228_s1, 256 }
  0x14   :  { %s27_s24 = sshll.u32 %s165_s23, 4  ;;  %p113_p8 = scmp.ne.s32.totalorder %s228_s1, %s112_s27  ;;  %s28_s24 = int_to_ptr.vmem [resolvable:$true] %s27_s24 }
  0x15   :  { %p116_p9 = scmp.lt.u32.totalorder %s112_s27, %s228_s1 }
  0x17   :  { %p118_p10 = pnand %p116_p9, %p113_p8 }
  0x19   :  { %121 = shalt.err (!%p118_p10)
}
  0x1a   :  { %s122_s4 = scalar_lea.vmem %s28_s24, 256  ;;  %p127_p12 = scmp.lt.s32.totalorder %s28_s24, %s28_s24 }
  0x1b   :  { %p123_p11 = scmp.ne.s32.totalorder %s28_s24, %s122_s4  ;;  %p128_p13 = scmp.lt.s32.totalorder %s122_s4, %s122_s4 }
  0x1d   :  { %p129_p0 = por %p128_p13, %p127_p12 }
  0x1f   :  { %p130_p1 = pnand %p129_p0, %p123_p11 }
  0x21   :  { %133 = shalt.err (!%p130_p1)
}
  0x22   :  { %33 = dma.hbm_to_vmem [thread:$0]  %s228_s1, 256, %s28_s24, [#allocation6], %s163_s19, %s163_s19, %s164_s20  }
  0x23   :  { %156 = dma.done.wait [#allocation3], 256  }
  0x24   :  { %157 = vsyncadd [#allocation3], 4294967040 }
  0x25   :  { %158 = dma.done.wait [#allocation6], 256  }
  0x26   :  { %159 = vsyncadd [#allocation6], 4294967040  ;;  %v40_v0 = vld [vmem:[#allocation2] sm:$0xff]  ;;  %v51_v1 = vld [vmem:[#allocation2 + $0x8] sm:$0xff]  ;;  %s166_s6 = smov [#allocation7]  }
  0x27   :  { %v41_v2 = vld [vmem:[#allocation5] sm:$0xff]  ;;  %v54_v3 = vadd.f32 %v51_v1, %v40_v0  ;;  %v53_v4 = vld [vmem:[#allocation5 + $0x8] sm:$0xff]  ;;  %v44_v5 = vmul.f32 %v40_v0, %v40_v0  ;;  %v56_v6 = vmul.f32 %v51_v1, %v51_v1  ;;  %s72_s7 = sshll.u32 %s166_s6, 4  ;;  %s73_s7 = int_to_ptr.vmem [resolvable:$true] %s72_s7 }
  0x28   :  { %v46_v7 = vmul.f32 %v41_v2, %v41_v2  ;;  %v55_v8 = vadd.f32 %v53_v4, %v41_v2  ;;  %v58_v9 = vmul.f32 %v53_v4, %v53_v4  ;;  %v48_v10 = vmul.f32 %v41_v2, %v40_v0  ;;  %s134_s1 = scalar_lea.vmem %s73_s7, 640  ;;  %p139_p3 = scmp.lt.s32.totalorder %s73_s7, %s73_s7 }
  0x29   :  { %v60_v11 = vmul.f32 %v53_v4, %v51_v1  ;;  %62 = vst [vmem:[#allocation7] sm:$0xff] %v54_v3  ;;  %v57_v12 = vadd.f32 %v56_v6, %v44_v5  ;;  %p135_p2 = scmp.ne.s32.totalorder %s73_s7, %s134_s1  ;;  %p140_p4 = scmp.lt.s32.totalorder %s134_s1, %s134_s1 }
  0x2a   :  { %63 = vst [vmem:[#allocation7 + $0x8] sm:$0xff] %v55_v8  ;;  %v59_v13 = vadd.f32 %v58_v9, %v46_v7 }
  0x2b   :  { %v61_v14 = vadd.f32 %v60_v11, %v48_v10  ;;  %64 = vst [vmem:[#allocation7 + $0x10] sm:$0xff] %v57_v12  ;;  %p141_p5 = por %p140_p4, %p139_p3 }
  0x2c   :  { %65 = vst [vmem:[#allocation7 + $0x18] sm:$0xff] %v59_v13 }
  0x2d   :  { %66 = vst [vmem:[#allocation7 + $0x20] sm:$0xff] %v61_v14  ;;  %p142_p6 = pnand %p141_p5, %p135_p2 }
  0x2f   :  { %145 = shalt.err (!%p142_p6)
}
  0x30   :  { %s146_s10 = scalar_lea.hbm %s229_s2, 640 }
  0x31   :  { %p147_p7 = scmp.ne.s32.totalorder %s229_s2, %s146_s10  ;;  %p150_p8 = scmp.lt.u32.totalorder %s146_s10, %s229_s2 }
  0x33   :  { %p152_p9 = pnand %p150_p8, %p147_p7 }
  0x35   :  { %155 = shalt.err (!%p152_p9)
}
  0x36   :  { %78 = dma.vmem_to_hbm [thread:$0]  %s73_s7, 640, %s229_s2, [#allocation4], %s163_s19, %s163_s19, %s164_s20  }
  0x37   :  { %160 = dma.done.wait [#allocation4], 640  }
  0x38   :  { %161 = vsyncadd [#allocation4], 4294966656 }
  0x39   :  { %82 = vsyncpa [#allocation3], 1 }
  0x3a   :  { %83 = vsyncpa [#allocation6], 1 }
  0x3b   :  { %84 = vsyncpa [#allocation4], 1 }

</bundles_post_ra>
